<compile_context>
chip_gen: v7x
topology: tpu7x:2x2x1
jax: 0.10.0
libtpu: 0.0.40
codegen_flags: <defaults>
</compile_context>

<pallas_src>
import functools

import jax
import jax.numpy as jnp
from jax import lax
from jax.experimental import pallas as pl
from jax.experimental.pallas import tpu as pltpu

EPS = 1e-5
# 512 keeps the (Cout, tile_l) f32 accumulator vreg-resident for Cout up to ~128
# (review: 1024 forces accumulator spills through the vld/vst slots).
_MAX_TILE_L = 512
# Max fraction of the scoped-VMEM budget the resident x window may occupy before
# the wrapper falls back to macro length-chunking.
_X_WINDOW_FRACTION = 0.35


def _round_up(x, m):
    return ((x + m - 1) // m) * m


@functools.lru_cache(maxsize=None)
def _vmem_limit_bytes():
    """Scoped-VMEM cap derived from the actual chip (v7x only has 64 MiB)."""
    cap = 64 * 1024 * 1024
    try:
        cap = int(getattr(pltpu.get_tpu_info(), "vmem_capacity_bytes", cap))
    except Exception:
        pass
    # ~20% headroom for Mosaic internal scratch / double buffers:
    #   v7x (64 MiB) -> ~51 MiB,  v5e/v6e (128 MiB) -> ~102 MiB.
    return min(int(cap * 0.80), 112 * 1024 * 1024)


def _conv_stats_call(xc, w2, *, block_l, c_tiles, c_len, K, Cin, Cout,
                     taps_by_phase, y_dtype, dim_sem, vmem_limit):
    """Pass 1 over one length chunk: conv tiles + per-tile BN partial stats.

    xc: (N, s, Cin, Lw) polyphase input window; w2: (Cout, K*Cin) folded weights.
    Returns (y_chunk (N, Cout, c_len), psum, psumsq) with stats (N, c_tiles, Cout, 1).
    """
    N, s, _, Lw = xc.shape
    rem = c_len - (c_tiles - 1) * block_l          # valid columns in the last tile
    need_mask = rem != block_l

    def kernel(x_ref, w_ref, y_ref, psum_ref, psumsq_ref, xcol_ref):
        if c_tiles == 1:
            l0 = 0                                  # fully static slicing
        else:
            l0 = pl.multiple_of(pl.program_id(1) * block_l, block_l)

        # Assemble the (K*Cin, block_l) im2col operand in VMEM from one contiguous,
        # tile-aligned lane window per stride-phase; per-tap offsets are static
        # slices of that window (review: fold the K taps into one contraction).
        for p, taps in taps_by_phase.items():
            o_hi = max(o for _, o in taps)
            win = x_ref[0, p, :, pl.ds(l0, block_l + o_hi)]   # (Cin, block_l+o_hi)
            for k, o in taps:
                xcol_ref[k * Cin:(k + 1) * Cin, :] = win[:, o:o + block_l]

        # Single MXU contraction of depth K*Cin, f32 accumulation.
        acc = lax.dot_general(w_ref[...], xcol_ref[...],
                              (((1,), (0,)), ((), ())),
                              preferred_element_type=jnp.float32)   # (Cout, block_l)
        y_ref[0] = acc.astype(y_ref.dtype)

        # BatchNorm partial statistics from the f32 accumulator (before any cast).
        def write_stats(a):
            psum_ref[0, 0] = jnp.sum(a, axis=1, keepdims=True)
            psumsq_ref[0, 0] = jnp.sum(a * a, axis=1, keepdims=True)

        if need_mask:
            is_last = pl.program_id(1) == c_tiles - 1

            @pl.when(is_last)
            def _():
                col = lax.broadcasted_iota(jnp.int32, (Cout, block_l), 1)
                write_stats(jnp.where(col < rem, acc, 0.0))

            @pl.when(jnp.logical_not(is_last))
            def _():
                write_stats(acc)
        else:
            write_stats(acc)

    flops = 2 * N * c_tiles * block_l * Cout * Cin * K
    bytes_accessed = (xc.dtype.itemsize * N * s * Cin * Lw
                      + w2.dtype.itemsize * Cout * K * Cin
                      + jnp.dtype(y_dtype).itemsize * N * Cout * c_len
                      + 4 * 2 * N * c_tiles * Cout)

    return pl.pallas_call(
        kernel,
        grid=(N, c_tiles),
        in_specs=[
            # Whole chunk window resident per batch element: its block index is
            # constant along the length-tile axis, so it is DMA'd once per batch
            # element instead of once per tile/tap.
            pl.BlockSpec((1, s, Cin, Lw), lambda i, j: (i, 0, 0, 0)),
            pl.BlockSpec((Cout, K * Cin), lambda i, j: (0, 0)),
        ],
        out_specs=(
            pl.BlockSpec((1, Cout, block_l), lambda i, j: (i, 0, j)),
            pl.BlockSpec((1, 1, Cout, 1), lambda i, j: (i, j, 0, 0)),
            pl.BlockSpec((1, 1, Cout, 1), lambda i, j: (i, j, 0, 0)),
        ),
        out_shape=(
            jax.ShapeDtypeStruct((N, Cout, c_len), y_dtype),
            jax.ShapeDtypeStruct((N, c_tiles, Cout, 1), jnp.float32),
            jax.ShapeDtypeStruct((N, c_tiles, Cout, 1), jnp.float32),
        ),
        scratch_shapes=[pltpu.VMEM((K * Cin, block_l), xc.dtype)],
        compiler_params=pltpu.CompilerParams(
            dimension_semantics=dim_sem, vmem_limit_bytes=vmem_limit),
        cost_estimate=pl.CostEstimate(
            flops=flops, transcendentals=0, bytes_accessed=bytes_accessed),
    )(xc, w2)


def _bn_apply_call(y, scale, shift, *, tile_l, dim_sem, vmem_limit):
    """Pass 2: out = y * scale + shift (pure HBM bandwidth), float32 output."""
    N, Cout, Lout = y.shape
    num_l = pl.cdiv(Lout, tile_l)
    out_dtype = jnp.float32

    def kernel(y_ref, scale_ref, shift_ref, out_ref):
        out_ref[...] = (y_ref[...].astype(jnp.float32) * scale_ref[...]
                        + shift_ref[...]).astype(out_ref.dtype)

    alias = {0: 0} if y.dtype == jnp.dtype(out_dtype) else {}
    return pl.pallas_call(
        kernel,
        grid=(N, num_l),
        in_specs=[
            pl.BlockSpec((1, Cout, tile_l), lambda i, j: (i, 0, j)),
            pl.BlockSpec((Cout, 1), lambda i, j: (0, 0)),
            pl.BlockSpec((Cout, 1), lambda i, j: (0, 0)),
        ],
        out_specs=pl.BlockSpec((1, Cout, tile_l), lambda i, j: (i, 0, j)),
        out_shape=jax.ShapeDtypeStruct((N, Cout, Lout), out_dtype),
        input_output_aliases=alias,
        compiler_params=pltpu.CompilerParams(
            dimension_semantics=dim_sem, vmem_limit_bytes=vmem_limit),
    )(y, scale, shift)


@functools.partial(
    jax.jit,
    static_argnames=("stride", "padding", "dilation", "compute_dtype",
                     "length_chunk"))
def basic_conv1d(x, w, gamma, beta, *, stride=1, padding=0, dilation=1,
                 compute_dtype=jnp.bfloat16, length_chunk=None):
    """BasicConv1d.forward: Conv1d(bias=False) then train-mode BatchNorm1d.

    x: (N, Cin, L) float32; w: (Cout, Cin, K); gamma/beta: (Cout,).
    compute_dtype: MXU-operand / pass-1-intermediate dtype (bfloat16 default;
      pass jnp.float32 for a full-precision path).
    length_chunk: optional cap (in output columns) per pass-1 call; None derives
      it from the chip's VMEM budget.  Returns (N, Cout, Lout) float32.
    """
    N, Cin, L = x.shape
    Cout, _, K = w.shape
    s, d = stride, dilation
    compute_dtype = jnp.dtype(compute_dtype)

    Lp = L + 2 * padding
    Lout = (Lp - d * (K - 1) - 1) // s + 1
    assert Lout > 0, "non-positive conv output length"

    # ---- length tiling ----
    tile_l = Lout if Lout <= _MAX_TILE_L else _MAX_TILE_L   # 512 = multiple of 128
    num_l = pl.cdiv(Lout, tile_l)
    halo = ((K - 1) * d) // s          # extra per-phase columns a tile may read

    # ---- host glue: zero halo + polyphase split (x keeps its NCL layout) ----
    # x_ph[n, p, c, m] = x_zero-padded[n, c, m*s + p]; the kernel then only issues
    # contiguous, tile-aligned lane reads, even for stride>1 / dilation>1.
    Ls = max(num_l * tile_l + halo, pl.cdiv(Lp, s))
    lxp = Ls * s
    x_ph = jnp.pad(x, ((0, 0), (0, 0), (padding, lxp - padding - L)))
    x_ph = x_ph.reshape(N, Cin, Ls, s).transpose(0, 3, 1, 2)    # (N, s, Cin, Ls)
    x_ph = x_ph.astype(compute_dtype)

    # Weights folded for a single contraction of depth K*Cin: w2[o, k*Cin+c] = w[o,c,k]
    w2 = jnp.transpose(w, (0, 2, 1)).reshape(Cout, K * Cin).astype(compute_dtype)

    # Static tap -> (phase, offset) map:  l*s + k*d  ==  s*(l + o_k) + p_k.
    taps_by_phase = {}
    for k in range(K):
        taps_by_phase.setdefault((k * d) % s, []).append((k, (k * d) // s))

    # ---- macro length-chunking keeps the resident x window inside VMEM ----
    vmem_limit = _vmem_limit_bytes()
    if length_chunk is not None:
        tiles_per_chunk = max(1, length_chunk // tile_l)
    else:
        sub = _round_up(max(Cin, 8), 8)
        bytes_per_col = 2 * s * sub * compute_dtype.itemsize    # x2: double buffer
        budget_cols = int(vmem_limit * _X_WINDOW_FRACTION) // bytes_per_col
        tiles_per_chunk = max(1, min(num_l, (budget_cols - halo) // tile_l))
    # v7x megacore: shard the batch axis, not the length axis, when N >= 2.
    dim_sem = ("parallel", "parallel" if N == 1 else "arbitrary")
    y_dtype = compute_dtype        # bf16 intermediate halves pass-2 read bytes

    y_chunks = []
    psum = jnp.zeros((Cout,), jnp.float32)
    psumsq = jnp.zeros((Cout,), jnp.float32)
    t = 0
    while t < num_l:
        c_tiles = min(tiles_per_chunk, num_l - t)
        col0 = t * tile_l
        c_len = min(Lout - col0, c_tiles * tile_l)
        block_l = c_len if c_tiles == 1 else tile_l
        if c_tiles == num_l:
            xc = x_ph                                   # single chunk: no copy
        else:
            lw = (c_tiles - 1) * tile_l + block_l + halo
            xc = lax.slice_in_dim(x_ph, col0, col0 + lw, axis=3)
        yc, ps, pss = _conv_stats_call(
            xc, w2, block_l=block_l, c_tiles=c_tiles, c_len=c_len, K=K, Cin=Cin,
            Cout=Cout, taps_by_phase=taps_by_phase, y_dtype=y_dtype,
            dim_sem=dim_sem, vmem_limit=vmem_limit)
        y_chunks.append(yc)
        psum = psum + jnp.sum(ps[..., 0], axis=(0, 1))
        psumsq = psumsq + jnp.sum(pss[..., 0], axis=(0, 1))
        t += c_tiles
    y = y_chunks[0] if len(y_chunks) == 1 else jnp.concatenate(y_chunks, axis=2)

    # ---- finalize train-mode BN stats, fold into per-channel scale/shift ----
    cnt = N * Lout
    mean = psum / cnt
    # Biased variance via E[y^2] - mean^2 (matches PyTorch's normalization).
    # TODO(synk): switch to a Welford/shifted-moment merge if cancellation ever
    # becomes an accuracy issue for large-mean activations.
    var = jnp.maximum(psumsq / cnt - mean * mean, 0.0)
    scale = gamma.astype(jnp.float32) * lax.rsqrt(var + EPS)
    shift = beta.astype(jnp.float32) - mean * scale

    return _bn_apply_call(y, scale.reshape(Cout, 1), shift.reshape(Cout, 1),
                          tile_l=tile_l, dim_sem=dim_sem, vmem_limit=vmem_limit)


def reference(x, w, gamma, beta, *, stride=1, padding=0, dilation=1):
    """Pure-JAX reference: PyTorch Conv1d(bias=False) + train-mode BatchNorm1d."""
    y = lax.conv_general_dilated(
        x, w, window_strides=(stride,), padding=((padding, padding),),
        rhs_dilation=(dilation,), dimension_numbers=("NCH", "OIH", "NCH"))
    mean = jnp.mean(y, axis=(0, 2), keepdims=True)
    var = jnp.mean((y - mean) ** 2, axis=(0, 2), keepdims=True)
    return ((y - mean) * lax.rsqrt(var + EPS) * gamma.reshape(1, -1, 1)
            + beta.reshape(1, -1, 1))


if __name__ == "__main__":
    def run_case(name, *, N, Cin, Cout, L, K, stride=1, padding=0, dilation=1,
                 compute_dtype=jnp.bfloat16, atol, rtol, length_chunk=None):
        kx, kw = jax.random.split(jax.random.PRNGKey(0))
        x = jax.random.normal(kx, (N, Cin, L), dtype=jnp.float32)
        bound = 1.0 / ((Cin * K) ** 0.5)            # Conv1d default init, bias=False
        w = jax.random.uniform(kw, (Cout, Cin, K), jnp.float32, -bound, bound)
        gamma = jnp.ones((Cout,), jnp.float32)      # fresh nn.BatchNorm1d
        beta = jnp.zeros((Cout,), jnp.float32)

        out = basic_conv1d(x, w, gamma, beta, stride=stride, padding=padding,
                           dilation=dilation, compute_dtype=compute_dtype,
                           length_chunk=length_chunk)
        out = jax.block_until_ready(out)
        ref = reference(x, w, gamma, beta, stride=stride, padding=padding,
                        dilation=dilation)
        assert out.shape == ref.shape, (name, out.shape, ref.shape)
        err = float(jnp.max(jnp.abs(out - ref)))
        assert jnp.allclose(out, ref, atol=atol, rtol=rtol), (name, err)

    # 1) module-sized case, full-precision path (tight tolerance).
    run_case("small_f32", N=2, Cin=4, Cout=8, L=16, K=3, padding=1,
             compute_dtype=jnp.float32, atol=1e-4, rtol=1e-4)
    # 2) same case on the default bf16 fast path.
    run_case("small_bf16", N=2, Cin=4, Cout=8, L=16, K=3, padding=1,
             compute_dtype=jnp.bfloat16, atol=6e-2, rtol=6e-2)
    # 3) multi-tile output with masked partial last tile (dynamic tile offsets).
    run_case("multi_tile_f32", N=2, Cin=8, Cout=16, L=700, K=3, padding=1,
             compute_dtype=jnp.float32, atol=1e-3, rtol=1e-3)
    # 4) forced macro length-chunk fallback (two pass-1 calls).
    run_case("chunked_f32", N=2, Cin=8, Cout=16, L=700, K=3, padding=1,
             compute_dtype=jnp.float32, atol=1e-3, rtol=1e-3, length_chunk=512)
    # 5) stride=2 / dilation=2 exercises the polyphase + halo path.
    run_case("strided_dilated_f32", N=2, Cin=4, Cout=8, L=64, K=3, stride=2,
             padding=2, dilation=2, compute_dtype=jnp.float32, atol=1e-3, rtol=1e-3)

    print("KERNEL_OK")
</pallas_src>

<mosaic_0001>
module attributes {stable_mosaic.version = 11 : i64} {
  func.func @kernel(%arg0: i32, %arg1: i32, %arg2: memref<1x1x4x18xf32, #tpu.memory_space<vmem>>, %arg3: memref<8x12xf32, #tpu.memory_space<vmem>>, %arg4: memref<1x8x16xf32, #tpu.memory_space<vmem>>, %arg5: memref<1x1x8x1xf32, #tpu.memory_space<vmem>>, %arg6: memref<1x1x8x1xf32, #tpu.memory_space<vmem>>, %arg7: memref<12x16xf32, #tpu.memory_space<vmem>>) attributes {dimension_semantics = [#tpu.dimension_semantics<parallel>, #tpu.dimension_semantics<arbitrary>], iteration_bounds = array<i64: 2, 1>, scalar_prefetch = 0 : i64, scratch_operands = 1 : i64, tpu.core_type = #tpu.core_type<tc>, window_params = [{transform_indices = @transform_0, window_bounds = array<i64: 1, 1, 4, 18>}, {pipeline_mode = #tpu.pipeline_mode<synchronous>, transform_indices = @transform_1, window_bounds = array<i64: 8, 12>}, {transform_indices = @transform_2, window_bounds = array<i64: 1, 8, 16>}, {transform_indices = @transform_3, window_bounds = array<i64: 1, 1, 8, 1>}, {transform_indices = @transform_4, window_bounds = array<i64: 1, 1, 8, 1>}]} {
    %c0 = arith.constant 0 : index
    %c0_0 = arith.constant 0 : index
    %c0_1 = arith.constant 0 : index
    %c0_2 = arith.constant 0 : index
    %0 = vector.load %arg2[%c0, %c0_0, %c0_1, %c0_2] : memref<1x1x4x18xf32, #tpu.memory_space<vmem>>, vector<1x1x4x18xf32>
    %1 = vector.shape_cast %0 : vector<1x1x4x18xf32> to vector<4x18xf32>
    %2 = vector.extract_strided_slice %1 {offsets = [0, 0], sizes = [4, 16], strides = [1, 1]} : vector<4x18xf32> to vector<4x16xf32>
    %c0_3 = arith.constant 0 : index
    %c0_4 = arith.constant 0 : index
    %3 = vector.load %arg7[%c0_3, %c0_4] : memref<12x16xf32, #tpu.memory_space<vmem>>, vector<4x16xf32>
    tpu.vector_store %arg7[%c0_3, %c0_4], %2 {strides = array<i32>} : memref<12x16xf32, #tpu.memory_space<vmem>>, vector<4x16xf32>,
    %4 = vector.extract_strided_slice %1 {offsets = [0, 1], sizes = [4, 16], strides = [1, 1]} : vector<4x18xf32> to vector<4x16xf32>
    %c4 = arith.constant 4 : index
    %c0_5 = arith.constant 0 : index
    %5 = vector.load %arg7[%c4, %c0_5] : memref<12x16xf32, #tpu.memory_space<vmem>>, vector<4x16xf32>
    tpu.vector_store %arg7[%c4, %c0_5], %4 {strides = array<i32>} : memref<12x16xf32, #tpu.memory_space<vmem>>, vector<4x16xf32>,
    %6 = vector.extract_strided_slice %1 {offsets = [0, 2], sizes = [4, 16], strides = [1, 1]} : vector<4x18xf32> to vector<4x16xf32>
    %c8 = arith.constant 8 : index
    %c0_6 = arith.constant 0 : index
    %7 = vector.load %arg7[%c8, %c0_6] : memref<12x16xf32, #tpu.memory_space<vmem>>, vector<4x16xf32>
    tpu.vector_store %arg7[%c8, %c0_6], %6 {strides = array<i32>} : memref<12x16xf32, #tpu.memory_space<vmem>>, vector<4x16xf32>,
    %c0_7 = arith.constant 0 : index
    %c0_8 = arith.constant 0 : index
    %8 = vector.load %arg3[%c0_7, %c0_8] : memref<8x12xf32, #tpu.memory_space<vmem>>, vector<8x12xf32>
    %c0_9 = arith.constant 0 : index
    %c0_10 = arith.constant 0 : index
    %9 = vector.load %arg7[%c0_9, %c0_10] : memref<12x16xf32, #tpu.memory_space<vmem>>, vector<12x16xf32>
    %cst = arith.constant dense<0.000000e+00> : vector<8x16xf32>
    %10 = tpu.matmul %8, %9, %cst {dimension_numbers = #tpu.dot_dimension_numbers<[1], [0], [0], [1], [0, 0, 1, 1], [], []>} : vector<8x12xf32>, vector<12x16xf32>, vector<8x16xf32> -> vector<8x16xf32>
    %c0_11 = arith.constant 0 : index
    %c0_12 = arith.constant 0 : index
    %c0_13 = arith.constant 0 : index
    %11 = vector.load %arg4[%c0_11, %c0_12, %c0_13] : memref<1x8x16xf32, #tpu.memory_space<vmem>>, vector<1x8x16xf32>
    %12 = vector.shape_cast %11 : vector<1x8x16xf32> to vector<8x16xf32>
    %13 = vector.shape_cast %10 : vector<8x16xf32> to vector<1x8x16xf32>
    tpu.vector_store %arg4[%c0_11, %c0_12, %c0_13], %13 {strides = array<i32>} : memref<1x8x16xf32, #tpu.memory_space<vmem>>, vector<1x8x16xf32>,
    %cst_14 = arith.constant dense<0.000000e+00> : vector<8xf32>
    %14 = vector.multi_reduction <add>, %10, %cst_14 [1] : vector<8x16xf32> to vector<8xf32>
    %15 = vector.shape_cast %14 : vector<8xf32> to vector<8x1xf32>
    %c0_15 = arith.constant 0 : index
    %c0_16 = arith.constant 0 : index
    %c0_17 = arith.constant 0 : index
    %c0_18 = arith.constant 0 : index
    %16 = vector.load %arg5[%c0_15, %c0_16, %c0_17, %c0_18] : memref<1x1x8x1xf32, #tpu.memory_space<vmem>>, vector<1x1x8x1xf32>
    %17 = vector.shape_cast %16 : vector<1x1x8x1xf32> to vector<8x1xf32>
    %18 = vector.shape_cast %15 : vector<8x1xf32> to vector<1x1x8x1xf32>
    tpu.vector_store %arg5[%c0_15, %c0_16, %c0_17, %c0_18], %18 {strides = array<i32>} : memref<1x1x8x1xf32, #tpu.memory_space<vmem>>, vector<1x1x8x1xf32>,
    %19 = arith.mulf %10, %10 : vector<8x16xf32>
    %cst_19 = arith.constant dense<0.000000e+00> : vector<8xf32>
    %20 = vector.multi_reduction <add>, %19, %cst_19 [1] : vector<8x16xf32> to vector<8xf32>
    %21 = vector.shape_cast %20 : vector<8xf32> to vector<8x1xf32>
    %c0_20 = arith.constant 0 : index
    %c0_21 = arith.constant 0 : index
    %c0_22 = arith.constant 0 : index
    %c0_23 = arith.constant 0 : index
    %22 = vector.load %arg6[%c0_20, %c0_21, %c0_22, %c0_23] : memref<1x1x8x1xf32, #tpu.memory_space<vmem>>, vector<1x1x8x1xf32>
    %23 = vector.shape_cast %22 : vector<1x1x8x1xf32> to vector<8x1xf32>
    %24 = vector.shape_cast %21 : vector<8x1xf32> to vector<1x1x8x1xf32>
    tpu.vector_store %arg6[%c0_20, %c0_21, %c0_22, %c0_23], %24 {strides = array<i32>} : memref<1x1x8x1xf32, #tpu.memory_space<vmem>>, vector<1x1x8x1xf32>,
    return
  }
  func.func @transform_0(%arg0: i32, %arg1: i32) -> (i32, i32, i32, i32) {
    %c0_i32 = arith.constant 0 : i32
    %c0_i32_0 = arith.constant 0 : i32
    %c0_i32_1 = arith.constant 0 : i32
    %c0_i32_2 = arith.constant 0 : i32
    return %arg0, %c0_i32, %c0_i32_0, %c0_i32_1 : i32, i32, i32, i32
  }
  func.func @transform_1(%arg0: i32, %arg1: i32) -> (i32, i32) {
    %c0_i32 = arith.constant 0 : i32
    %c0_i32_0 = arith.constant 0 : i32
    %c0_i32_1 = arith.constant 0 : i32
    return %c0_i32, %c0_i32_0 : i32, i32
  }
  func.func @transform_2(%arg0: i32, %arg1: i32) -> (i32, i32, i32) {
    %c0_i32 = arith.constant 0 : i32
    %c0_i32_0 = arith.constant 0 : i32
    return %arg0, %c0_i32, %arg1 : i32, i32, i32
  }
  func.func @transform_3(%arg0: i32, %arg1: i32) -> (i32, i32, i32, i32) {
    %c0_i32 = arith.constant 0 : i32
    %c0_i32_0 = arith.constant 0 : i32
    %c0_i32_1 = arith.constant 0 : i32
    return %arg0, %arg1, %c0_i32, %c0_i32_0 : i32, i32, i32, i32
  }
  func.func @transform_4(%arg0: i32, %arg1: i32) -> (i32, i32, i32, i32) {
    %c0_i32 = arith.constant 0 : i32
    %c0_i32_0 = arith.constant 0 : i32
    %c0_i32_1 = arith.constant 0 : i32
    return %arg0, %arg1, %c0_i32, %c0_i32_0 : i32, i32, i32, i32
  }
}

module attributes {stable_mosaic.version = 11 : i64} {
  func.func @kernel(%arg0: i32, %arg1: i32, %arg2: memref<1x8x16xf32, #tpu.memory_space<vmem>>, %arg3: memref<8x1xf32, #tpu.memory_space<vmem>>, %arg4: memref<8x1xf32, #tpu.memory_space<vmem>>, %arg5: memref<1x8x16xf32, #tpu.memory_space<vmem>>) attributes {dimension_semantics = [#tpu.dimension_semantics<parallel>, #tpu.dimension_semantics<arbitrary>], iteration_bounds = array<i64: 2, 1>, scalar_prefetch = 0 : i64, scratch_operands = 0 : i64, tpu.core_type = #tpu.core_type<tc>, window_params = [{transform_indices = @transform_0, window_bounds = array<i64: 1, 8, 16>}, {pipeline_mode = #tpu.pipeline_mode<synchronous>, transform_indices = @transform_1, window_bounds = array<i64: 8, 1>}, {pipeline_mode = #tpu.pipeline_mode<synchronous>, transform_indices = @transform_2, window_bounds = array<i64: 8, 1>}, {transform_indices = @transform_3, window_bounds = array<i64: 1, 8, 16>}]} {
    %c0 = arith.constant 0 : index
    %c0_0 = arith.constant 0 : index
    %c0_1 = arith.constant 0 : index
    %0 = vector.load %arg2[%c0, %c0_0, %c0_1] : memref<1x8x16xf32, #tpu.memory_space<vmem>>, vector<1x8x16xf32>
    %c0_2 = arith.constant 0 : index
    %c0_3 = arith.constant 0 : index
    %1 = vector.load %arg3[%c0_2, %c0_3] : memref<8x1xf32, #tpu.memory_space<vmem>>, vector<8x1xf32>
    %2 = vector.shape_cast %1 : vector<8x1xf32> to vector<1x8x1xf32>
    %3 = vector.broadcast %2 : vector<1x8x1xf32> to vector<1x8x16xf32>
    %4 = arith.mulf %0, %3 : vector<1x8x16xf32>
    %c0_4 = arith.constant 0 : index
    %c0_5 = arith.constant 0 : index
    %5 = vector.load %arg4[%c0_4, %c0_5] : memref<8x1xf32, #tpu.memory_space<vmem>>, vector<8x1xf32>
    %6 = vector.shape_cast %5 : vector<8x1xf32> to vector<1x8x1xf32>
    %7 = vector.broadcast %6 : vector<1x8x1xf32> to vector<1x8x16xf32>
    %8 = arith.addf %4, %7 : vector<1x8x16xf32>
    %c0_6 = arith.constant 0 : index
    %c0_7 = arith.constant 0 : index
    %c0_8 = arith.constant 0 : index
    %9 = vector.load %arg5[%c0_6, %c0_7, %c0_8] : memref<1x8x16xf32, #tpu.memory_space<vmem>>, vector<1x8x16xf32>
    tpu.vector_store %arg5[%c0_6, %c0_7, %c0_8], %8 {strides = array<i32>} : memref<1x8x16xf32, #tpu.memory_space<vmem>>, vector<1x8x16xf32>,
    return
  }
  func.func @transform_0(%arg0: i32, %arg1: i32) -> (i32, i32, i32) {
    %c0_i32 = arith.constant 0 : i32
    %c0_i32_0 = arith.constant 0 : i32
    return %arg0, %c0_i32, %arg1 : i32, i32, i32
  }
  func.func @transform_1(%arg0: i32, %arg1: i32) -> (i32, i32) {
    %c0_i32 = arith.constant 0 : i32
    %c0_i32_0 = arith.constant 0 : i32
    %c0_i32_1 = arith.constant 0 : i32
    return %c0_i32, %c0_i32_0 : i32, i32
  }
  func.func @transform_2(%arg0: i32, %arg1: i32) -> (i32, i32) {
    %c0_i32 = arith.constant 0 : i32
    %c0_i32_0 = arith.constant 0 : i32
    %c0_i32_1 = arith.constant 0 : i32
    return %c0_i32, %c0_i32_0 : i32, i32
  }
  func.func @transform_3(%arg0: i32, %arg1: i32) -> (i32, i32, i32) {
    %c0_i32 = arith.constant 0 : i32
    %c0_i32_0 = arith.constant 0 : i32
    return %arg0, %c0_i32, %arg1 : i32, i32, i32
  }
}

</mosaic_0001>

<bundles_post_ra>
// kernel: basic_conv1d.2
= control target key start
LH: loop header
LB: loop body
LE: loop exit
PB: predicated region body
PF: predicated region fallthrough
CT: control target
= control target key end

     0   :  { %10 = vsyncpa [#allocation4], 0  ;;  %s835_s0 = inlined_call_operand.vmem [shape: f32[2,1,4,18], index: 0, kind: input, shape index: {}]   ;;  %s836_s1 = inlined_call_operand.vmem [shape: f32[8,12], index: 1, kind: input, shape index: {}]   ;;  %s837_s2 = inlined_call_operand.hbm [shape: f32[2,8,16], index: 2, kind: output, shape index: {0}]   ;;  %s838_s3 = inlined_call_operand.vmem [shape: f32[2,1,8,1], index: 3, kind: output, shape index: {1}]   ;;  %s839_s4 = inlined_call_operand.vmem [shape: f32[2,1,8,1], index: 4, kind: output, shape index: {2}]  }
   0x1   :  { %12 = vsyncpa [#allocation4 + $0x1], 0  ;;  %s716_s15 = smov 0   ;;  %s718_s16 = smov 0  }
   0x2   :  { %s720_s17 = smov 0   ;;  %s722_s18 = smov 0  }
   0x3   :  { %s724_s19 = smov 0   ;;  %s726_s20 = smov 0  }
   0x4 LB: > { %s514_s21 = sadd.s32 4294967295, %s682_s20   ;;  %s515_s22 = sadd.s32 4294967294, %s682_s20   ;;  %s682_s20 = sphi %s726_s20, %s18_s20   ;;  %s678_s19 = sphi %s724_s19, %s846_s19   ;;  %s674_s18 = sphi %s722_s18, %s845_s18   ;;  %s670_s17 = sphi %s720_s17, %s844_s17   ;;  %s666_s16 = sphi %s718_s16, %s843_s16   ;;  %s662_s15 = sphi %s716_s15, %s842_s15  }
   0x5   : > { %s30_s23 = sadd.s32 1, %s678_s19  ;;  %s86_s24 = sadd.s32 1, %s670_s17 }
   0x6   : > { %p32_p0 = scmp.ge.s32.totalorder %s30_s23, 2  ;;  %p96_p1 = scmp.ne.s32.totalorder %s670_s17, %s666_s16 }
   0x7   : > { %p97_p2 = scmp.eq.s32.totalorder %s514_s21, 1  ;;  %p102_p3 = scmp.ne.s32.totalorder %s666_s16, %s662_s15 }
   0x8   : > { %s848_s23 = smov (%p32_p0, %s30_s23), 0  ;;  %p103_p5 = scmp.eq.s32.totalorder %s515_s22, 1 }
   0x9   : > { %p756_p4 = por %p97_p2, %p96_p1  ;;  %s81_s26 = ssub.s32 %s678_s19, %s848_s23 }
   0xa   : > { %p518_p6 = scmp.ge.s32.totalorder %s682_s20, 1  ;;  %p84_p7 = scmp.eq.s32.totalorder %s81_s26, 0 }
   0xb   : > { %p763_p8 = por %p103_p5, %p102_p3  ;;  %p187_p9 = scmp.lt.s32.totalorder %s682_s20, 3 }
   0xc   : > { %s769_s28 = scalar_select %p84_p7, %s670_s17, %s86_s24  }
   0xd   : > { %p188_p10 = pnand %p518_p6, %p187_p9 }
   0xe   : > { %p226_p11 = scmp.lt.s32.totalorder (!%p188_p10), %s674_s18, 1  ;;  %v684_v0 = vmov (!%p188_p10), 0.0|0.0   ;;  %vm245_vm0 = vcmask (!%p188_p10), 125952   ;;  %s685_s8 = smov (!%p188_p10), 127   ;;  %vm686_vm1 = vmmov (!%p188_p10), 0   ;;  %v687_v2 = vmov (!%p188_p10), 0.0  }
   0xf   : > { %191 = sbr.rel (%p188_p10) target bundleno = 519 (0x207), region = 28  ;;  %539 = vmatprep.subr.bf16.mxu0 (!%p188_p10), %v684_v0  ;;  %536 = vmatprep.mubr.msk.f32.mxu0 (!%p188_p10), %vm686_vm1, %v687_v2  ;;  %s688_s9 = smov (!%p188_p10), 126   ;;  %vm263_vm2 = vcmask (!%p188_p10), 1043456   ;;  %vm689_vm3 = vmmov (!%p188_p10), 1   ;;  %v256_v8 = vld [vmem:[%s836_s1] sm:$0xff] (!%p188_p10)  ;;  %vm259_vm5 = vcmask (!%p188_p10), 97280  }
  0x10   : > { %vm541_vm4 = vmpackc.low (!%p188_p10), %vm263_vm2, %vm689_vm3  ;;  %s205_s12 = sand.u32 (!%p188_p10), 1, %s666_s16   ;;  %vm337_vm6 = vcmask (!%p188_p10), 130048   ;;  %s526_s21 = sshll.u32 (!%p188_p10), %s674_s18, 7 }
  0x11   : > { %s519_s13 = sshll.u32 (!%p188_p10), %s205_s12, 3  ;;  %s350_s5 = scalar_lea.sflag (!%p188_p10), [#allocation4], %s205_s12 }
  0x12   : > { %s207_s14 = scalar_lea.vmem (!%p188_p10), [#allocation3], %s519_s13 }
  0x13   : > { %s378_s22 = sshll.u32 (!%p188_p10), %s207_s14, 4  ;;  %s379_s22 = int_to_ptr.vmem [resolvable:$true] %s378_s22 }
  0x14   : > { %s604_s6 = scalar_lea.vmem (!%p188_p10), %s379_s22, 128 }
  0x15   : > { %p605_p12 = scmp.ne.s32.totalorder (!%p188_p10), %s379_s22, %s604_s6 }
  0x16   : > { %s773_s29 = scalar_select %p226_p11, %s674_s18, 1 }
  0x17   : > { %p606_p13 = pnand %p605_p12, %p756_p4 }
  0x18   : > { %s520_s30 = sshll.u32 %s773_s29, 2 }
  0x19   : > { %s229_s7 = scalar_lea.vmem %s835_s0, %s520_s30  ;;  %s787_s30 = scalar_lea.hbm %s837_s2, %s526_s21 }
  0x1a   : > { %v244_v1 = vld [vmem:[%s229_s7] sm:$0xf]  ;;  %p607_p0 = pneg %p606_p13  ;;  %s690_s7 = smov [#allocation3]  }
  0x1b   : > { %248 = vrot.lane.b32.xlu0 %v244_v1, %s685_s8  ;;  %246 = vst.msk [vmem:[#allocation2] sm:$0xf] %vm245_vm0, %v244_v1  ;;  %s608_s8 = sshll.u32 %s690_s7, 4  ;;  %s609_s8 = int_to_ptr.vmem [resolvable:$false] %s608_s8 }
  0x1c   : > { %p611_p1 = scmp.lt.s32.totalorder %s379_s22, %s609_s8 }
  0x1f   : > { %252 = vrot.lane.b32.xlu0 %v244_v1, %s688_s9  ;;  %s610_s9 = scalar_lea.vmem %s609_s8, 256 }
  0x20   : > { %p612_p2 = scmp.lt.s32.totalorder %s610_s9, %s604_s6 }
  0x22   : > { %p613_p3 = por %p612_p2, %p611_p1 }
  0x24   : > { %p614_p5 = pnand %p613_p3, %p607_p0 }
  0x8d   : > { %v249_v3 = vpop.permute.xlu0 %248 }
  0x8e   : > { %251 = vst.msk [vmem:[#allocation2 + $0x4] sm:$0xf] %vm245_vm0, %v249_v3 }
  0x91   : > { %v253_v4 = vpop.permute.xlu0 %252 }
  0x92   : > { %255 = vst.msk [vmem:[#allocation2 + $0x8] sm:$0xf] %vm245_vm0, %v253_v4 }
  0x95   : > { %v257_v5 = vld [vmem:[#allocation2] sm:$0xff] }
  0x99   : > { %v258_v6 = vld [vmem:[#allocation2 + $0x8] sm:$0xf] }
  0x9a   : > { %v540_v7 = vpack.c.bf16 %v258_v6, %v257_v5 }
  0x9c   : > { %542 = vmatpush3.bf16.msk.msra.mxu0 %vm541_vm4, %v540_v7 }
  0x9f   : > { %537 = vmatmul.mubr.msk.f32.vlgmr.msra.gmra.mrb[0].mxu0 %vm259_vm5, %v256_v8 }
 0x172   : > { %v333_v9 = vpop.f32.mrb[0].mxu0 }
 0x173   : > { %v538_v10 = vpop.f32.mrb[1].mxu0  ;;  %v339_v11 = vsel %vm337_vm6, %v333_v9, 0.0  ;;  %v344_v12 = vmul.f32 %v333_v9, %v333_v9  ;;  %338 = vst.msk [vmem:[%s207_s14] sm:$0xff] %vm337_vm6, %v333_v9 }
 0x174   : > { %340 = vadd.xlane.f32.xlu1 %v339_v11 }
 0x175   : > { %v345_v13 = vsel %vm337_vm6, %v344_v12, 0.0 }
 0x178   : > { %346 = vadd.xlane.f32.xlu1 %v345_v13 }
 0x179   : > { %617 = shalt.err (!%p614_p5)
}
 0x17a   : > { %s618_s18 = scalar_lea.hbm %s787_s30, 128  ;;  %s622_s12 = scalar_lea.hbm %s837_s2, 256 }
 0x17b   : > { %p619_p6 = scmp.ne.s32.totalorder %s787_s30, %s618_s18  ;;  %p623_p10 = scmp.lt.u32.totalorder %s787_s30, %s837_s2 }
 0x17c   : > { %p624_p11 = scmp.lt.u32.totalorder %s622_s12, %s618_s18  ;;  %p626_p13 = scmp.lt.u32.totalorder %s618_s18, %s787_s30 }
 0x17d   : > { %p620_p7 = pnand %p619_p6, %p756_p4 }
 0x17e   : > { %p625_p12 = por %p624_p11, %p623_p10 }
 0x17f   : > { %p621_p9 = pneg %p620_p7 }
 0x180   : > { %p627_p0 = por %p626_p13, %p625_p12 }
 0x182   : > { %p628_p1 = pnand %p627_p0, %p621_p9 }
 0x184   : > { %631 = shalt.err (!%p628_p1)
}
 0x185   : > { %543 = dma.vmem_to_hbm [thread:$0]  (%p756_p4), %s379_s22, 128, %s787_s30, %s350_s5   ;;  %vm342_vm7 = vcmask 7168  }
 0x186   : > { %s521_s21 = sshll.u32 %s773_s29, 3 }
 0x187   : > { %s236_s6 = scalar_lea.vmem %s838_s3, %s521_s21  ;;  %s243_s9 = scalar_lea.vmem %s839_s4, %s521_s21 }
 0x201   : > { %v341_v14 = vpop.xlane.xlu1 %340 }
 0x202   : > { %343 = vst.msk [vmem:[%s236_s6] sm:$0xff] %vm342_vm7, %v341_v14 }
 0x205   : > { %v347_v15 = vpop.xlane.xlu1 %346 }
 0x206   : > { %348 = vst.msk [vmem:[%s243_s9] sm:$0xff] %vm342_vm7, %v347_v15 }
 0x207 PF: > { %p549_p2 = scmp.ge.s32.totalorder %s682_s20, 2  ;;  %s396_s25 = sand.u32 1, %s662_s15  }
 0x208   : > { %s397_s29 = scalar_lea.sflag [#allocation4], %s396_s25 }
 0x209   : > { %p546_p4 = pnand %p549_p2, %p763_p8 }
 0x20b   : > { %657 = dma.done.wait (!%p546_p4), %s397_s29, 128  }
 0x20c   : > { %659 = vsyncadd (!%p546_p4), %s397_s29, 4294967168  ;;  %s18_s20 = sadd.s32 1, %s682_s20   ;;  %s842_s15 = smov %s666_s16 }
 0x20d   : > { %p15_p3 = scmp.ge.s32.totalorder %s18_s20, 4   ;;  %s843_s16 = smov %s670_s17 }
 0x20e   : > { %s844_s17 = smov %s769_s28  ;;  %s845_s18 = smov %s678_s19 }
 0x20f   : > { %s846_s19 = smov %s848_s23  ;;  %17 = sbr.rel (!%p15_p3) target bundleno = 4 (0x4), region = 87 }
 0x216   :  { %422 = vsyncpa [#allocation4], 1 }
 0x217   :  { %424 = vsyncpa [#allocation4 + $0x1], 1 }

// kernel: basic_conv1d.3
= control target key start
LH: loop header
LB: loop body
LE: loop exit
PB: predicated region body
PF: predicated region fallthrough
CT: control target
= control target key end

     0   :  { %8 = vsyncpa [#allocation3], 0  ;;  %s707_s0 = inlined_call_operand.hbm [shape: f32[2,8,16], index: 0, kind: input, shape index: {}, may-alias: {0,3}]   ;;  %s708_s1 = inlined_call_operand.vmem [shape: f32[8,1], index: 1, kind: input, shape index: {}]   ;;  %s709_s2 = inlined_call_operand.vmem [shape: f32[8,1], index: 2, kind: input, shape index: {}]   ;;  %s710_s3 = inlined_call_operand.hbm [shape: f32[2,8,16], index: 3, kind: output, shape index: {}, may-alias: {0,3}]  }
   0x1   :  { %10 = vsyncpa [#allocation3 + $0x1], 0 }
   0x2   :  { %11 = vsyncpa [#allocation4], 0 }
   0x3   :  { %13 = vsyncpa [#allocation4 + $0x1], 0  ;;  %s529_s12 = smov 0   ;;  %s531_s13 = smov 0  }
   0x4   :  { %s533_s14 = smov 0   ;;  %s535_s15 = smov 0  }
   0x5   :  { %s537_s16 = smov 0   ;;  %s539_s17 = smov 0  }
   0x6 LB: > { %s315_s18 = sadd.s32 4294967295, %s504_s17   ;;  %s316_s19 = sadd.s32 4294967294, %s504_s17   ;;  %s504_s17 = sphi %s539_s17, %s19_s17   ;;  %s500_s16 = sphi %s537_s16, %s726_s16   ;;  %s496_s15 = sphi %s535_s15, %s725_s15   ;;  %s492_s14 = sphi %s533_s14, %s724_s14   ;;  %s488_s13 = sphi %s531_s13, %s723_s13   ;;  %s484_s12 = sphi %s529_s12, %s722_s12  }
   0x7   : > { %s31_s20 = sadd.s32 1, %s500_s16  ;;  %s40_s21 = sadd.s32 1, %s492_s14 }
   0x8   : > { %p33_p0 = scmp.ge.s32.totalorder %s31_s20, 2  ;;  %p47_p1 = scmp.ne.s32.totalorder %s492_s14, %s488_s13 }
   0x9   : > { %p48_p2 = scmp.eq.s32.totalorder %s504_s17, 0  ;;  %p53_p3 = scmp.ne.s32.totalorder %s488_s13, %s484_s12 }
   0xa   : > { %s728_s20 = smov (%p33_p0, %s31_s20), 0  ;;  %p54_p5 = scmp.eq.s32.totalorder %s315_s18, 0 }
   0xb   : > { %p570_p4 = por %p48_p2, %p47_p1  ;;  %s35_s23 = ssub.s32 %s500_s16, %s728_s20 }
   0xc   : > { %p121_p6 = scmp.eq.s32.totalorder %s315_s18, 1  ;;  %p38_p7 = scmp.eq.s32.totalorder %s35_s23, 0 }
   0xd   : > { %p576_p8 = por %p54_p5, %p53_p3  ;;  %p127_p10 = scmp.eq.s32.totalorder %s316_s19, 1 }
   0xe   : > { %p580_p9 = por %p121_p6, %p47_p1  ;;  %p340_p13 = scmp.lt.s32.totalorder %s504_s17, 2 }
   0xf   : > { %s585_s26 = scalar_select %p38_p7, %s492_s14, %s40_s21  }
  0x10   : > { %s714_s25 = scalar_select %p580_p9, 1, 0 }
  0x11   : > { %p587_p11 = por %p127_p10, %p53_p3  ;;  %s153_s28 = sand.u32 1, %s492_s14  }
  0x12   : > { %s319_s29 = sshll.u32 %s153_s28, 3  ;;  %s320_s30 = sshll.u32 %s500_s16, 7 }
  0x13   : > { %s715_s27 = scalar_select %p587_p11, 1, 0 }
  0x14   : > { %s598_s6 = scalar_lea.hbm %s707_s0, %s320_s30  ;;  %s157_s7 = scalar_lea.vmem [#allocation2], %s319_s29 }
  0x15   : > { %s165_s8 = sshll.u32 %s157_s7, 4  ;;  %p604_p0 = pnand %p340_p13, %p570_p4  ;;  %s600_s8 = int_to_ptr.vmem [resolvable:$true] %s165_s8 }
  0x16   : > { %s154_s10 = scalar_lea.sflag [#allocation3], %s153_s28  ;;  %s392_s11 = scalar_lea.hbm %s598_s6, 128 }
  0x17   : > { %p393_p3 = scmp.ne.s32.totalorder %s598_s6, %s392_s11  ;;  %p394_p5 = pneg %p604_p0 }
  0x18   : > { %s397_s21 = scalar_lea.hbm %s707_s0, 256  ;;  %p398_p4 = scmp.lt.u32.totalorder %s598_s6, %s707_s0 }
  0x19   : > { %p395_p6 = pnand %p394_p5, %p393_p3  ;;  %p399_p10 = scmp.lt.u32.totalorder %s397_s21, %s392_s11 }
  0x1a   : > { %p401_p12 = scmp.lt.u32.totalorder %s392_s11, %s598_s6 }
  0x1b   : > { %p396_p7 = pneg %p395_p6  ;;  %p400_p13 = por %p399_p10, %p398_p4 }
  0x1d   : > { %p402_p1 = por %p401_p12, %p400_p13 }
  0x1f   : > { %p403_p2 = pnand %p402_p1, %p396_p7 }
  0x21   : > { %406 = shalt.err (!%p403_p2)
}
  0x22   : > { %s407_s28 = scalar_lea.vmem %s600_s8, 128  ;;  %s506_s29 = smov [#allocation2]  }
  0x23   : > { %p408_p3 = scmp.ne.s32.totalorder %s600_s8, %s407_s28  ;;  %s412_s30 = sshll.u32 %s506_s29, 4  ;;  %s413_s30 = int_to_ptr.vmem [resolvable:$false] %s412_s30 }
  0x24   : > { %s414_s4 = scalar_lea.vmem %s413_s30, 256  ;;  %p415_p9 = scmp.lt.s32.totalorder %s600_s8, %s413_s30 }
  0x25   : > { %p410_p6 = pnand %p408_p3, %p394_p5  ;;  %p416_p4 = scmp.lt.s32.totalorder %s414_s4, %s407_s28 }
  0x27   : > { %p411_p11 = pneg %p410_p6  ;;  %p417_p10 = por %p416_p4, %p415_p9 }
  0x29   : > { %p418_p12 = pnand %p417_p10, %p411_p11 }
  0x2b   : > { %421 = shalt.err (!%p418_p12)
}
  0x2c   : > { %335 = dma.hbm_to_vmem [thread:$0]  (!%p604_p0), %s598_s6, 128, %s600_s8, %s154_s10  }
  0x2d   : > { %p717_p1 = scmp.lt.s32.totalorder %s504_s17, 3  ;;  %p718_p2 = scmp.ge.s32.totalorder %s504_s17, 1 }
  0x2f   : > { %p171_p5 = pnand %p718_p2, %p717_p1 }
  0x30   : > { %s640_s5 = sand.u32 (!%p171_p5), 1, %s488_s13  }
  0x31   : > { %174 = sbr.rel (%p171_p5) target bundleno = 207 (0xcf), region = 32  ;;  %s322_s7 = sshll.u32 (!%p171_p5), %s640_s5, 3 }
  0x32   : > { %s177_s11 = scalar_lea.sflag (!%p171_p5), [#allocation3], %s640_s5  ;;  %s180_s18 = scalar_lea.vmem (!%p171_p5), [#allocation2], %s322_s7 }
  0x38   : > { %475 = dma.done.wait (%p576_p8), %s177_s11, 128  }
  0x39   : > { %477 = vsyncadd (%p576_p8), %s177_s11, 4294967168  ;;  %v507_v0 = vmov 0   ;;  %v204_v1 = vld [vmem:[%s708_s1] sm:$0xff]  ;;  %s325_s19 = sshll.u32 %s496_s15, 7  ;;  %s202_s24 = scalar_lea.vmem [#allocation5], %s322_s7  ;;  %vm218_vm0 = vcmask 130048  }
  0x3a   : > { %391 = vset.pattern.permute.xlu0 %v507_v0  ;;  %v211_v2 = vld [vmem:[%s709_s2] sm:$0xff]  ;;  %s235_s21 = sshll.u32 %s202_s24, 4  ;;  %s658_s28 = scalar_lea.hbm %s710_s3, %s325_s19  ;;  %s660_s21 = int_to_ptr.vmem [resolvable:$true] %s235_s21 }
  0x3b   : > { %207 = vperm.xlu0 %391, %v204_v1   ;;  %v203_v4 = vld [vmem:[%s180_s18] sm:$0xff]  ;;  %s221_s29 = scalar_lea.sflag [#allocation4], %s640_s5  ;;  %s422_s30 = scalar_lea.vmem %s660_s21, 128 }
  0x3c   : > { %p423_p8 = scmp.ne.s32.totalorder %s660_s21, %s422_s30  ;;  %p719_p9 = scmp.ne.s32.totalorder %s714_s25, 0 }
  0x3d   : > { %s508_s15 = smov [#allocation5]  }
  0x3e   : > { %p424_p11 = pnand %p423_p8, %p719_p9  ;;  %s426_s4 = sshll.u32 %s508_s15, 4  ;;  %s427_s4 = int_to_ptr.vmem [resolvable:$false] %s426_s4 }
  0x3f   : > { %214 = vperm.xlu0 %391, %v211_v2   ;;  %s428_s7 = scalar_lea.vmem %s427_s4, 256  ;;  %p429_p7 = scmp.lt.s32.totalorder %s660_s21, %s427_s4 }
  0x40   : > { %p425_p0 = pneg %p424_p11  ;;  %p430_p13 = scmp.lt.s32.totalorder %s428_s7, %s422_s30 }
  0x42   : > { %p431_p3 = por %p430_p13, %p429_p7 }
  0x44   : > { %p432_p6 = pnand %p431_p3, %p425_p0 }
  0xba   : > { %v208_v3 = vpop.permute.xlu0 %207 }
  0xbb   : > { %v210_v5 = vmul.f32 %v208_v3, %v203_v4 }
  0xbe   : > { %v215_v6 = vpop.permute.xlu0 %214 }
  0xbf   : > { %v217_v7 = vadd.f32 %v215_v6, %v210_v5 }
  0xc1   : > { %219 = vst.msk [vmem:[%s202_s24] sm:$0xff] %vm218_vm0, %v217_v7 }
  0xc2   : > { %435 = shalt.err (!%p432_p6)
}
  0xc3   : > { %s436_s5 = scalar_lea.hbm %s658_s28, 128  ;;  %s440_s6 = scalar_lea.hbm %s710_s3, 256 }
  0xc4   : > { %p437_p4 = scmp.ne.s32.totalorder %s658_s28, %s436_s5  ;;  %p441_p1 = scmp.lt.u32.totalorder %s658_s28, %s710_s3 }
  0xc5   : > { %p442_p2 = scmp.lt.u32.totalorder %s440_s6, %s436_s5  ;;  %p444_p8 = scmp.lt.u32.totalorder %s436_s5, %s658_s28 }
  0xc6   : > { %p438_p10 = pnand %p437_p4, %p719_p9 }
  0xc7   : > { %p443_p5 = por %p442_p2, %p441_p1 }
  0xc8   : > { %p439_p12 = pneg %p438_p10 }
  0xc9   : > { %p445_p11 = por %p444_p8, %p443_p5 }
  0xcb   : > { %p446_p0 = pnand %p445_p11, %p439_p12 }
  0xcd   : > { %449 = shalt.err (!%p446_p0)
}
  0xce   : > { %330 = dma.vmem_to_hbm [thread:$0]  (%p719_p9), %s660_s21, 128, %s658_s28, %s221_s29  }
  0xcf PF: > { %s247_s10 = sand.u32 1, %s484_s12   ;;  %p720_p7 = scmp.ne.s32.totalorder %s715_s27, 0 }
  0xd0   : > { %p721_p13 = scmp.ge.s32.totalorder %s504_s17, 2  ;;  %s248_s19 = scalar_lea.sflag [#allocation4], %s247_s10 }
  0xd2   : > { %p337_p3 = pnand %p721_p13, %p720_p7 }
  0xd4   : > { %479 = dma.done.wait (!%p337_p3), %s248_s19, 128  }
  0xd5   : > { %481 = vsyncadd (!%p337_p3), %s248_s19, 4294967168  ;;  %s19_s17 = sadd.s32 1, %s504_s17   ;;  %s722_s12 = smov %s488_s13 }
  0xd6   : > { %p16_p6 = scmp.ge.s32.totalorder %s19_s17, 4   ;;  %s723_s13 = smov %s492_s14 }
  0xd7   : > { %s724_s14 = smov %s585_s26  ;;  %s725_s15 = smov %s500_s16 }
  0xd8   : > { %s726_s16 = smov %s728_s20  ;;  %18 = sbr.rel (!%p16_p6) target bundleno = 6 (0x6), region = 77 }
  0xdf   :  { %253 = vsyncpa [#allocation3], 1 }
  0xe0   :  { %255 = vsyncpa [#allocation3 + $0x1], 1 }
  0xe1   :  { %256 = vsyncpa [#allocation4], 1 }
  0xe2   :  { %258 = vsyncpa [#allocation4 + $0x1], 1 }

</bundles_post_ra>
